<compile_context>
chip_gen: v5e
topology: v5e:2x2
jax: 0.10.0
libtpu: 0.0.40
codegen_flags: <defaults>
</compile_context>

<pallas_src>
import functools

import jax
import jax.numpy as jnp
from jax.experimental import pallas as pl
from jax.experimental.pallas import tpu as pltpu


_BUF_FACTOR = 6          # double-buffered in + out blocks, plus headroom
_MIN_STEP_BYTES = 1 << 20


# ---------------------------------------------------------------------------
# Sizing helpers (generation aware).
# ---------------------------------------------------------------------------

def _vmem_budget_bytes():
    """Usable VMEM budget: ~78% of physical capacity, capped at 100 MiB.

    v5e/v6e (128 MiB physical) -> ~100 MiB; v7x (64 MiB physical) -> ~50 MiB.
    """
    cap = 128 << 20
    try:
        cap = int(getattr(pltpu.get_tpu_info(), "vmem_capacity_bytes", cap))
    except Exception:
        pass
    return int(min(cap * 0.78, 100 << 20))


def _padded_block_bytes(nb, c, hw, itemsize):
    """VMEM footprint of one (nb, c, hw) block after (sublane, lane) padding."""
    sublane = 8 * max(1, 4 // itemsize)          # 8 f32 / 16 bf16 / 32 int8
    c_pad = -(-c // sublane) * sublane
    hw_pad = -(-hw // 128) * 128
    return nb * c_pad * hw_pad * itemsize


def _pick_nb(n, per_sample_bytes, budget_bytes, target_bytes, weight_bytes):
    """Samples per grid step for the single-pass kernel; 0 => two-pass fallback."""
    usable = budget_bytes - weight_bytes - (2 << 20)
    if usable < _BUF_FACTOR * per_sample_bytes:
        return 0                                  # one sample does not fit VMEM
    nb = min(n,
             usable // (_BUF_FACTOR * per_sample_bytes),
             max(1, target_bytes // per_sample_bytes))
    # v7x megacore: prefer >=4 grid steps (>=2 per TensorCore), but only while
    # each step still moves >= ~1 MiB of HBM traffic (never shred tiny work).
    if n >= 4 and (n // 4) * per_sample_bytes >= _MIN_STEP_BYTES:
        nb = min(nb, n // 4)
    return max(1, int(nb))


def _x_block_spec(block_shape, index_map, extra_buffering):
    """x input spec, optionally with 3-deep pipelining when VMEM allows it."""
    if extra_buffering:
        try:
            return pl.BlockSpec(block_shape, index_map,
                                pipeline_mode=pl.Buffered(3))
        except Exception:       # pipeline_mode / Buffered unavailable -> default
            pass
    return pl.BlockSpec(block_shape, index_map)


# ---------------------------------------------------------------------------
# Kernels.
# ---------------------------------------------------------------------------

def _attention_scales(y, w1_ref, b1_ref, w2_ref, b2_ref):
    """(Nb, C) f32 pooled means -> (Nb, C) f32 sigmoid gates (VPU/XLU/EUP)."""
    w1 = w1_ref[...].astype(jnp.float32)                        # (Cr, C)
    h = jnp.sum(w1[None, :, :] * y[:, None, :], axis=-1)        # (Nb, Cr)
    h = jnp.maximum(h + b1_ref[...].astype(jnp.float32), 0.0)   # ReLU
    w2 = w2_ref[...].astype(jnp.float32)                        # (C, Cr)
    s = jnp.sum(w2[None, :, :] * h[:, None, :], axis=-1)        # (Nb, C)
    return jax.nn.sigmoid(s + b2_ref[...].astype(jnp.float32))


def _ca_fused_kernel(x_ref, w1_ref, b1_ref, w2_ref, b2_ref, o_ref, *, inv_hw):
    # Single pass: pool -> FCs -> scale; one streamed read + write of x.
    x = x_ref[...]                                              # (Nb, C, HW)
    y = jnp.sum(x, axis=-1, dtype=jnp.float32) * inv_hw         # (Nb, C) f32
    s = _attention_scales(y, w1_ref, b1_ref, w2_ref, b2_ref)    # (Nb, C) f32
    o_ref[...] = (x * s.astype(x.dtype)[:, :, None]).astype(o_ref.dtype)


def _ca_pool_kernel(x_ref, w1_ref, b1_ref, w2_ref, b2_ref, s_ref, acc_ref, *,
                    inv_hw, hw_tile, hw_total, mask_tail):
    # Two-pass fallback, pass 1: accumulate the spatial sum over HW tiles and
    # fuse the FCs + sigmoid at the last tile; emits per-sample scales.
    t = pl.program_id(1)

    @pl.when(t == 0)
    def _init():
        acc_ref[...] = jnp.zeros_like(acc_ref)

    x = x_ref[...]                                              # (1, C, hw_tile)
    if mask_tail:
        lane = jax.lax.broadcasted_iota(jnp.int32, x.shape, 2) + t * hw_tile
        x = jnp.where(lane < hw_total, x, jnp.zeros_like(x))
    acc_ref[...] += jnp.sum(x, axis=-1, dtype=jnp.float32)      # (1, C)

    @pl.when(t == pl.num_programs(1) - 1)
    def _finalize():
        y = acc_ref[...] * inv_hw                               # (1, C)
        s = _attention_scales(y, w1_ref, b1_ref, w2_ref, b2_ref)
        s_ref[...] = s[:, :, None]                              # (1, C, 1)


def _ca_scale_kernel(x_ref, s_ref, o_ref):
    # Two-pass fallback, pass 2: apply the per-channel scales to an HW tile.
    x = x_ref[...]                                              # (1, C, hw_tile)
    o_ref[...] = (x * s_ref[...].astype(x.dtype)).astype(o_ref.dtype)


# ---------------------------------------------------------------------------
# pallas_call wrappers.
# ---------------------------------------------------------------------------

def _ca_single_pass(x_flat, w1, b1c, w2, b2c, nb, inv_hw, budget,
                    weight_bytes, itemsize):
    N, C, HW = x_flat.shape
    Cr = w1.shape[0]
    steps = pl.cdiv(N, nb)
    block_bytes = _padded_block_bytes(nb, C, HW, itemsize)
    vmem_limit = int(min(budget,
                         max(24 << 20,
                             _BUF_FACTOR * block_bytes + weight_bytes + (2 << 20))))
    # 3-deep input buffering: cheap on v5e/v6e, only used if it fits on v7x.
    extra_buf = steps >= 3 and (
        (_BUF_FACTOR + 2) * block_bytes + weight_bytes + (2 << 20) <= budget)

    return pl.pallas_call(
        functools.partial(_ca_fused_kernel, inv_hw=inv_hw),
        out_shape=jax.ShapeDtypeStruct((N, C, HW), x_flat.dtype),
        grid_spec=pltpu.PrefetchScalarGridSpec(
            num_scalar_prefetch=0,
            grid=(steps,),
            in_specs=[
                _x_block_spec((nb, C, HW), lambda i: (i, 0, 0), extra_buf),
                pl.BlockSpec((Cr, C), lambda i: (0, 0)),
                pl.BlockSpec((1, Cr), lambda i: (0, 0)),
                pl.BlockSpec((C, Cr), lambda i: (0, 0)),
                pl.BlockSpec((1, C), lambda i: (0, 0)),
            ],
            out_specs=pl.BlockSpec((nb, C, HW), lambda i: (i, 0, 0)),
        ),
        compiler_params=pltpu.CompilerParams(
            dimension_semantics=("parallel",),
            vmem_limit_bytes=vmem_limit,
        ),
    )(x_flat, w1, b1c, w2, b2c)


def _ca_two_pass(x_flat, w1, b1c, w2, b2c, inv_hw, budget, target_bytes,
                 weight_bytes, itemsize, hw_tile):
    N, C, HW = x_flat.shape
    Cr = w1.shape[0]

    if hw_tile is None:
        tile128 = _padded_block_bytes(1, C, 128, itemsize)
        usable = max(0, budget - weight_bytes - (2 << 20))
        n_tiles = max(1, min(usable // (_BUF_FACTOR * tile128),
                             max(1, target_bytes // tile128)))
        hw_tile = int(n_tiles) * 128
    if hw_tile >= HW:
        hw_tile = HW                                  # one full-width tile
    else:
        hw_tile = max(128, (hw_tile // 128) * 128)    # lane-aligned tile
    T = pl.cdiv(HW, hw_tile)
    mask_tail = (hw_tile != HW) and (HW % hw_tile != 0)

    block_bytes = _padded_block_bytes(1, C, hw_tile, itemsize)
    vmem_limit = int(min(budget,
                         max(24 << 20,
                             _BUF_FACTOR * block_bytes + weight_bytes + (2 << 20))))

    # Pass 1: pooled means -> channel scales (N, C, 1) in f32.
    scales = pl.pallas_call(
        functools.partial(_ca_pool_kernel, inv_hw=inv_hw, hw_tile=hw_tile,
                          hw_total=HW, mask_tail=mask_tail),
        out_shape=jax.ShapeDtypeStruct((N, C, 1), jnp.float32),
        grid_spec=pltpu.PrefetchScalarGridSpec(
            num_scalar_prefetch=0,
            grid=(N, T),
            in_specs=[
                pl.BlockSpec((1, C, hw_tile), lambda n, t: (n, 0, t)),
                pl.BlockSpec((Cr, C), lambda n, t: (0, 0)),
                pl.BlockSpec((1, Cr), lambda n, t: (0, 0)),
                pl.BlockSpec((C, Cr), lambda n, t: (0, 0)),
                pl.BlockSpec((1, C), lambda n, t: (0, 0)),
            ],
            out_specs=pl.BlockSpec((1, C, 1), lambda n, t: (n, 0, 0)),
            scratch_shapes=[pltpu.VMEM((1, C), jnp.float32)],
        ),
        compiler_params=pltpu.CompilerParams(
            dimension_semantics=("parallel", "arbitrary"),
            vmem_limit_bytes=vmem_limit,
        ),
    )(x_flat, w1, b1c, w2, b2c)

    # Pass 2: stream x again, applying the per-channel scales.
    return pl.pallas_call(
        _ca_scale_kernel,
        out_shape=jax.ShapeDtypeStruct((N, C, HW), x_flat.dtype),
        grid_spec=pltpu.PrefetchScalarGridSpec(
            num_scalar_prefetch=0,
            grid=(N, T),
            in_specs=[
                pl.BlockSpec((1, C, hw_tile), lambda n, t: (n, 0, t)),
                pl.BlockSpec((1, C, 1), lambda n, t: (n, 0, 0)),
            ],
            out_specs=pl.BlockSpec((1, C, hw_tile), lambda n, t: (n, 0, t)),
        ),
        compiler_params=pltpu.CompilerParams(
            dimension_semantics=("parallel", "parallel"),
            vmem_limit_bytes=vmem_limit,
        ),
    )(x_flat, scales)


def ca_layer(x, w1, b1, w2, b2, *, nb=None, force_two_pass=False, hw_tile=None):
    """Channel attention: x * sigmoid(FC_up(relu(FC_down(avg_pool(x))))).

    x: (N, C, H, W); w1: (Cr, C); b1: (Cr,); w2: (C, Cr); b2: (C,).
    `nb`, `force_two_pass`, `hw_tile` are testing / tuning overrides.
    """
    N, C, H, W = x.shape
    Cr = w1.shape[0]
    HW = H * W
    inv_hw = float(1.0 / HW)
    itemsize = jnp.dtype(x.dtype).itemsize

    # Free, contiguous reshape — no padding, no extra HBM copies.
    x_flat = x.reshape(N, C, HW)
    b1c = b1.reshape(1, Cr)
    b2c = b2.reshape(1, C)

    budget = _vmem_budget_bytes()
    # Bigger blocks amortize the ~0.35us/step overhead; smaller target on v7x.
    target_bytes = (8 << 20) if budget >= (80 << 20) else (3 << 20)
    weight_bytes = sum(int(a.size) * jnp.dtype(a.dtype).itemsize
                       for a in (w1, b1c, w2, b2c))
    per_sample = _padded_block_bytes(1, C, HW, itemsize)

    if nb is None:
        nb = 0 if force_two_pass else _pick_nb(N, per_sample, budget,
                                               target_bytes, weight_bytes)
    if nb < 1:
        out = _ca_two_pass(x_flat, w1, b1c, w2, b2c, inv_hw, budget,
                           target_bytes, weight_bytes, itemsize, hw_tile)
    else:
        out = _ca_single_pass(x_flat, w1, b1c, w2, b2c, int(nb), inv_hw,
                              budget, weight_bytes, itemsize)
    return out.reshape(N, C, H, W)


def ca_layer_ref(x, w1, b1, w2, b2):
    """Pure-JAX reference matching the PyTorch forward."""
    y = jnp.mean(x, axis=(2, 3))                       # (N, C)
    h = jnp.maximum(y @ w1.T + b1, 0.0)                # (N, Cr)
    s = jax.nn.sigmoid(h @ w2.T + b2)                  # (N, C)
    return x * s[:, :, None, None]


if __name__ == "__main__":
    def make_inputs(key, n, c, h, w, reduction):
        cr = max(1, c // reduction)
        kx, kw1, kb1, kw2, kb2 = jax.random.split(key, 5)
        x = jax.random.normal(kx, (n, c, h, w), dtype=jnp.float32)
        # Conv2d(C, Cr, 1) weight (Cr, C, 1, 1) -> (Cr, C); Conv2d(Cr, C, 1) -> (C, Cr)
        w1 = jax.random.normal(kw1, (cr, c), dtype=jnp.float32) * 0.1
        b1 = jax.random.normal(kb1, (cr,), dtype=jnp.float32) * 0.1
        w2 = jax.random.normal(kw2, (c, cr), dtype=jnp.float32) * 0.1
        b2 = jax.random.normal(kb2, (c,), dtype=jnp.float32) * 0.1
        return x, w1, b1, w2, b2

    k1, k2, k3 = jax.random.split(jax.random.PRNGKey(0), 3)

    # 1) Primary case: CALayer(channel=32, reduction=16), N=2, 16x16 spatial.
    x, w1, b1, w2, b2 = make_inputs(k1, 2, 32, 16, 16, 16)
    out = jax.block_until_ready(ca_layer(x, w1, b1, w2, b2))
    ref = ca_layer_ref(x, w1, b1, w2, b2)
    assert out.shape == x.shape
    assert jnp.allclose(out, ref, atol=1e-5, rtol=1e-5), "single-pass mismatch"

    # 2) Multi-step grid with a partial trailing batch block and a spatial size
    #    that is not a multiple of 128 (exercises masked tail stores + Buffered).
    x, w1, b1, w2, b2 = make_inputs(k2, 5, 32, 18, 18, 16)
    out = jax.block_until_ready(ca_layer(x, w1, b1, w2, b2, nb=2))
    ref = ca_layer_ref(x, w1, b1, w2, b2)
    assert jnp.allclose(out, ref, atol=1e-5, rtol=1e-5), "partial-block mismatch"

    # 3) Forced two-pass (VMEM fallback) path with a partial trailing HW tile.
    x, w1, b1, w2, b2 = make_inputs(k3, 3, 32, 18, 18, 16)
    out = jax.block_until_ready(
        ca_layer(x, w1, b1, w2, b2, force_two_pass=True, hw_tile=128))
    ref = ca_layer_ref(x, w1, b1, w2, b2)
    assert jnp.allclose(out, ref, atol=1e-5, rtol=1e-5), "two-pass mismatch"

    print("KERNEL_OK")
</pallas_src>

<mosaic_0001>
module attributes {stable_mosaic.version = 11 : i64} {
  func.func @_ca_fused_kernel(%arg0: i32, %arg1: memref<2x32x256xf32, #tpu.memory_space<vmem>>, %arg2: memref<2x32xf32, #tpu.memory_space<vmem>>, %arg3: memref<1x2xf32, #tpu.memory_space<vmem>>, %arg4: memref<32x2xf32, #tpu.memory_space<vmem>>, %arg5: memref<1x32xf32, #tpu.memory_space<vmem>>, %arg6: memref<2x32x256xf32, #tpu.memory_space<vmem>>) attributes {dimension_semantics = [#tpu.dimension_semantics<parallel>], iteration_bounds = array<i64: 1>, scalar_prefetch = 0 : i64, scratch_operands = 0 : i64, tpu.core_type = #tpu.core_type<tc>, window_params = [{transform_indices = @transform_0, window_bounds = array<i64: 2, 32, 256>}, {pipeline_mode = #tpu.pipeline_mode<synchronous>, transform_indices = @transform_1, window_bounds = array<i64: 2, 32>}, {pipeline_mode = #tpu.pipeline_mode<synchronous>, transform_indices = @transform_2, window_bounds = array<i64: 1, 2>}, {pipeline_mode = #tpu.pipeline_mode<synchronous>, transform_indices = @transform_3, window_bounds = array<i64: 32, 2>}, {pipeline_mode = #tpu.pipeline_mode<synchronous>, transform_indices = @transform_4, window_bounds = array<i64: 1, 32>}, {transform_indices = @transform_5, window_bounds = array<i64: 2, 32, 256>}]} {
    %c0 = arith.constant 0 : index
    %c0_0 = arith.constant 0 : index
    %c0_1 = arith.constant 0 : index
    %0 = vector.load %arg1[%c0, %c0_0, %c0_1] : memref<2x32x256xf32, #tpu.memory_space<vmem>>, vector<2x32x256xf32>
    %cst = arith.constant dense<0.000000e+00> : vector<2x32xf32>
    %1 = vector.multi_reduction <add>, %0, %cst [2] : vector<2x32x256xf32> to vector<2x32xf32>
    %cst_2 = arith.constant 3.906250e-03 : f32
    %2 = vector.broadcast %cst_2 : f32 to vector<2x32xf32>
    %3 = arith.mulf %1, %2 : vector<2x32xf32>
    %c0_3 = arith.constant 0 : index
    %c0_4 = arith.constant 0 : index
    %4 = vector.load %arg2[%c0_3, %c0_4] : memref<2x32xf32, #tpu.memory_space<vmem>>, vector<2x32xf32>
    %5 = vector.shape_cast %4 : vector<2x32xf32> to vector<1x2x32xf32>
    %6 = vector.shape_cast %3 : vector<2x32xf32> to vector<2x1x32xf32>
    %7 = vector.broadcast %5 : vector<1x2x32xf32> to vector<2x2x32xf32>
    %8 = vector.broadcast %6 : vector<2x1x32xf32> to vector<2x2x32xf32>
    %9 = arith.mulf %7, %8 : vector<2x2x32xf32>
    %cst_5 = arith.constant dense<0.000000e+00> : vector<2x2xf32>
    %10 = vector.multi_reduction <add>, %9, %cst_5 [2] : vector<2x2x32xf32> to vector<2x2xf32>
    %c0_6 = arith.constant 0 : index
    %c0_7 = arith.constant 0 : index
    %11 = vector.load %arg3[%c0_6, %c0_7] : memref<1x2xf32, #tpu.memory_space<vmem>>, vector<1x2xf32>
    %12 = vector.broadcast %11 : vector<1x2xf32> to vector<2x2xf32>
    %13 = arith.addf %10, %12 : vector<2x2xf32>
    %cst_8 = arith.constant 0.000000e+00 : f32
    %14 = vector.broadcast %cst_8 : f32 to vector<2x2xf32>
    %15 = arith.maximumf %13, %14 : vector<2x2xf32>
    %c0_9 = arith.constant 0 : index
    %c0_10 = arith.constant 0 : index
    %16 = vector.load %arg4[%c0_9, %c0_10] : memref<32x2xf32, #tpu.memory_space<vmem>>, vector<32x2xf32>
    %17 = vector.shape_cast %16 : vector<32x2xf32> to vector<1x32x2xf32>
    %18 = vector.shape_cast %15 : vector<2x2xf32> to vector<2x1x2xf32>
    %19 = vector.broadcast %17 : vector<1x32x2xf32> to vector<2x32x2xf32>
    %20 = vector.broadcast %18 : vector<2x1x2xf32> to vector<2x32x2xf32>
    %21 = arith.mulf %19, %20 : vector<2x32x2xf32>
    %cst_11 = arith.constant dense<0.000000e+00> : vector<2x32xf32>
    %22 = vector.multi_reduction <add>, %21, %cst_11 [2] : vector<2x32x2xf32> to vector<2x32xf32>
    %c0_12 = arith.constant 0 : index
    %c0_13 = arith.constant 0 : index
    %23 = vector.load %arg5[%c0_12, %c0_13] : memref<1x32xf32, #tpu.memory_space<vmem>>, vector<1x32xf32>
    %24 = vector.broadcast %23 : vector<1x32xf32> to vector<2x32xf32>
    %25 = arith.addf %22, %24 : vector<2x32xf32>
    %26 = arith.negf %25 : vector<2x32xf32>
    %27 = math.exp %26 : vector<2x32xf32>
    %cst_14 = arith.constant 1.000000e+00 : f32
    %28 = vector.broadcast %cst_14 : f32 to vector<2x32xf32>
    %29 = arith.addf %28, %27 : vector<2x32xf32>
    %30 = arith.divf %28, %29 : vector<2x32xf32>
    %31 = vector.shape_cast %30 : vector<2x32xf32> to vector<2x32x1xf32>
    %32 = vector.broadcast %31 : vector<2x32x1xf32> to vector<2x32x256xf32>
    %33 = arith.mulf %0, %32 : vector<2x32x256xf32>
    %c0_15 = arith.constant 0 : index
    %c0_16 = arith.constant 0 : index
    %c0_17 = arith.constant 0 : index
    %34 = vector.load %arg6[%c0_15, %c0_16, %c0_17] : memref<2x32x256xf32, #tpu.memory_space<vmem>>, vector<2x32x256xf32>
    tpu.vector_store %arg6[%c0_15, %c0_16, %c0_17], %33 {strides = array<i32>} : memref<2x32x256xf32, #tpu.memory_space<vmem>>, vector<2x32x256xf32>,
    return
  }
  func.func @transform_0(%arg0: i32) -> (i32, i32, i32) {
    %c0_i32 = arith.constant 0 : i32
    %c0_i32_0 = arith.constant 0 : i32
    %c0_i32_1 = arith.constant 0 : i32
    return %arg0, %c0_i32, %c0_i32_0 : i32, i32, i32
  }
  func.func @transform_1(%arg0: i32) -> (i32, i32) {
    %c0_i32 = arith.constant 0 : i32
    %c0_i32_0 = arith.constant 0 : i32
    %c0_i32_1 = arith.constant 0 : i32
    return %c0_i32, %c0_i32_0 : i32, i32
  }
  func.func @transform_2(%arg0: i32) -> (i32, i32) {
    %c0_i32 = arith.constant 0 : i32
    %c0_i32_0 = arith.constant 0 : i32
    %c0_i32_1 = arith.constant 0 : i32
    return %c0_i32, %c0_i32_0 : i32, i32
  }
  func.func @transform_3(%arg0: i32) -> (i32, i32) {
    %c0_i32 = arith.constant 0 : i32
    %c0_i32_0 = arith.constant 0 : i32
    %c0_i32_1 = arith.constant 0 : i32
    return %c0_i32, %c0_i32_0 : i32, i32
  }
  func.func @transform_4(%arg0: i32) -> (i32, i32) {
    %c0_i32 = arith.constant 0 : i32
    %c0_i32_0 = arith.constant 0 : i32
    %c0_i32_1 = arith.constant 0 : i32
    return %c0_i32, %c0_i32_0 : i32, i32
  }
  func.func @transform_5(%arg0: i32) -> (i32, i32, i32) {
    %c0_i32 = arith.constant 0 : i32
    %c0_i32_0 = arith.constant 0 : i32
    %c0_i32_1 = arith.constant 0 : i32
    return %arg0, %c0_i32, %c0_i32_0 : i32, i32, i32
  }
}

</mosaic_0001>

<bundles_post_ra>
// kernel: tpu_custom_call.1
= control target key start
LH: loop header
LB: loop body
LE: loop exit
PB: predicated region body
PF: predicated region fallthrough
CT: control target
= control target key end

     0   :  { %10 = vsyncpa [#allocation3], 0  ;;  %s769_s0 = inlined_call_operand.hbm [shape: f32[2,32,256], index: 0, kind: input, shape index: {}]   ;;  %s770_s1 = inlined_call_operand.vmem [shape: f32[2,32], index: 1, kind: input, shape index: {}]   ;;  %s771_s2 = inlined_call_operand.vmem [shape: f32[1,2], index: 2, kind: input, shape index: {}]   ;;  %s772_s3 = inlined_call_operand.vmem [shape: f32[32,2], index: 3, kind: input, shape index: {}]   ;;  %s773_s4 = inlined_call_operand.vmem [shape: f32[1,32], index: 4, kind: input, shape index: {}]   ;;  %s774_s5 = inlined_call_operand.hbm [shape: f32[2,32,256], index: 5, kind: output, shape index: {}]  }
   0x1   :  { %11 = vsyncpa [#allocation4], 0  ;;  %s16_s20 = sshll.u32 %s769_s0, 4  ;;  %s598_s21 = smov [#allocation2]   ;;  %s17_s20 = int_to_ptr.hbm [resolvable:$true] %s16_s20 }
   0x2   :  { %s18_s22 = sshll.u32 %s598_s21, 4  ;;  %s599_s23 = smov 256   ;;  %s19_s22 = int_to_ptr.vmem [resolvable:$true] %s18_s22 }
   0x3   :  { %s600_s24 = smov 16  }
   0x4   :  { %24 = dma.hbm_to_vmem [thread:$0]  %s17_s20, 2048, %s19_s22, [#allocation3], %s599_s23, %s599_s23, %s600_s24  }
   0x5   :  { %594 = dma.done.wait [#allocation3], 2048  }
   0x6   :  { %595 = vsyncadd [#allocation3], 4294965248  ;;  %v639_v0 = vld [vmem:[#allocation2 + $0x40] sm:$0xff]  ;;  %v641_v1 = vld [vmem:[#allocation2 + $0x48] sm:$0xff]  ;;  %v94_v24 = vlaneseq  ;;  %vm99_vm0 = vcmask 130112   ;;  %vm103_vm1 = vcmask 195712  }
   0x7   :  { %v643_v2 = vld [vmem:[#allocation2] sm:$0xff]  ;;  %v65_v3 = vadd.f32 %v641_v1, %v639_v0  ;;  %v647_v4 = vld [vmem:[#allocation2 + $0x8] sm:$0xff]  ;;  %v657_v9 = vld [vmem:[#allocation2 + $0x50] sm:$0xff]  ;;  %vm107_vm2 = vcmask 261312   ;;  %vm120_vm3 = vcmask 254976   ;;  %vm183_vm4 = vcmask 15360  }
   0x8   :  { %v649_v5 = vld [vmem:[#allocation2 + $0x20] sm:$0xff]  ;;  %v651_v6 = vld [vmem:[#allocation2 + $0x28] sm:$0xff]  ;;  %v53_v7 = vadd.f32 %v647_v4, %v643_v2  ;;  %v659_v10 = vld [vmem:[#allocation2 + $0x58] sm:$0xff]  ;;  %v687_v25 = vshrl.u32 %v94_v24, 7  ;;  %v699_v31 = vand.u32 127, %v94_v24  ;;  %s477_s13 = sshll.u32 %s774_s5, 4  ;;  %s478_s13 = int_to_ptr.hbm [resolvable:$true] %s477_s13 }
   0x9   :  { %v59_v8 = vadd.f32 %v651_v6, %v649_v5  ;;  %66 = vadd.xlane.f32.xlu1 %v65_v3  ;;  %v661_v11 = vld [vmem:[#allocation2 + $0x10] sm:$0xff]  ;;  %v663_v12 = vld [vmem:[#allocation2 + $0x18] sm:$0xff]  ;;  %v665_v13 = vld [vmem:[#allocation2 + $0x60] sm:$0xff]  ;;  %v68_v15 = vadd.f32 %v659_v10, %v657_v9 }
   0xa   :  { %54 = vadd.xlane.f32.xlu0 %v53_v7  ;;  %v667_v14 = vld [vmem:[#allocation2 + $0x68] sm:$0xff]  ;;  %v56_v16 = vadd.f32 %v663_v12, %v661_v11  ;;  %v675_v18 = vld [vmem:[#allocation2 + $0x70] sm:$0xff]  ;;  %v677_v19 = vld [vmem:[#allocation2 + $0x78] sm:$0xff]  ;;  %503 = vset.pattern.permute.xlu1 %v687_v25  ;;  %v97_v33 = vadd.s32 4294967288, %v699_v31  ;;  %v101_v43 = vadd.s32 4294967280, %v699_v31  ;;  %v105_v47 = vadd.s32 4294967272, %v699_v31 }
   0xb   :  { %60 = vadd.xlane.f32.xlu2 %v59_v8  ;;  %v71_v17 = vadd.f32 %v667_v14, %v665_v13  ;;  %v679_v20 = vld [vmem:[#allocation2 + $0x30] sm:$0xff]  ;;  %v681_v21 = vld [vmem:[#allocation2 + $0x38] sm:$0xff]  ;;  %v74_v22 = vadd.f32 %v677_v19, %v675_v18  ;;  %v512_v26 = vld [vmem:[%s771_s2] ss:$0 sm:$0xff] }
   0xc   :  { %v62_v23 = vadd.f32 %v681_v21, %v679_v20  ;;  %v696_v27 = vld [vmem:[%s773_s4] ss:$0 sm:$0xff] }
   0xd   :  { %v85_v57 = vld [vmem:[%s770_s1] sm:$0x3] }
  0x11   :  { %69 = vadd.xlane.f32.xlu1 %v68_v15  ;;  %v601_v15 = vmov 0  }
  0x12   :  { %57 = vadd.xlane.f32.xlu0 %v56_v16  ;;  %504 = vset.pattern.permute.xlu2 %v601_v15 }
  0x13   :  { %72 = vadd.xlane.f32.xlu2 %v71_v17  ;;  %505 = vset.pattern.permute.xlu0 %v601_v15 }
  0x19   :  { %75 = vadd.xlane.f32.xlu1 %v74_v22 }
  0x1a   :  { %63 = vadd.xlane.f32.xlu0 %v62_v23 }
  0x32   :  { %134 = vperm.xlu1 %503, %v512_v26  }
  0x3a   :  { %215 = vperm.xlu1 %503, %v696_v27  }
  0x7c   :  { %v67_v28 = vpop.xlane.xlu1 %66 }
  0x7d   :  { %v55_v29 = vpop.xlane.xlu0 %54  ;;  %v81_v39 = vmul.f32 0.00390625, %v67_v28 }
  0x7e   :  { %v61_v30 = vpop.xlane.xlu2 %60  ;;  %v77_v37 = vmul.f32 0.00390625, %v55_v29  ;;  %v225_v29 = vadd.s32 16, %v687_v25 }
  0x7f   :  { %v109_v45 = vperm.slane %v81_v39, %v699_v31  ;;  %v79_v46 = vmul.f32 0.00390625, %v61_v30 }
  0x80   :  { %v96_v42 = vperm.slane %v77_v37, %v699_v31 }
  0x81   :  { %v102_v55 = vperm.slane %v79_v46, %v101_v43 }
  0x84   :  { %v70_v32 = vpop.xlane.xlu1 %69 }
  0x85   :  { %v82_v34 = vmul.f32 0.00390625, %v70_v32  ;;  %v58_v35 = vpop.xlane.xlu0 %57  ;;  %v142_v32 = vld [vmem:[%s772_s3 + $0x8] sm:$0xff] }
  0x86   :  { %v73_v36 = vpop.xlane.xlu2 %72  ;;  %v78_v38 = vmul.f32 0.00390625, %v58_v35 }
  0x87   :  { %v83_v40 = vmul.f32 0.00390625, %v73_v36  ;;  %v110_v41 = vperm.slane %v82_v34, %v97_v33  ;;  %v143_v34 = vld [vmem:[%s772_s3 + $0x10] sm:$0xff] }
  0x88   :  { %v98_v44 = vperm.slane %v78_v38, %v97_v33  ;;  %v141_v33 = vld [vmem:[%s772_s3] sm:$0xff] }
  0x89   :  { %v112_v48 = vperm.slane %v83_v40, %v101_v43  ;;  %v111_v50 = vsel %vm99_vm0, %v110_v41, %v109_v45  ;;  %v231_v43 = vadd.s32 24, %v687_v25 }
  0x8a   :  { %v100_v53 = vsel %vm99_vm0, %v98_v44, %v96_v42  ;;  %v144_v42 = vld [vmem:[%s772_s3 + $0x18] sm:$0xff]  ;;  %v219_v44 = vadd.s32 8, %v687_v25  ;;  %s602_s3 = smov [#allocation5]  }
  0x8b   :  { %v113_v59 = vsel %vm103_vm1, %v112_v48, %v111_v50  ;;  %v104_v61 = vsel %vm103_vm1, %v102_v55, %v100_v53  ;;  %508 = vset.pattern.permute.xlu1 %v231_v43  ;;  %s475_s10 = sshll.u32 %s602_s3, 4  ;;  %s476_s10 = int_to_ptr.vmem [resolvable:$true] %s475_s10 }
  0x8c   :  { %v76_v49 = vpop.xlane.xlu1 %75 }
  0x8d   :  { %v84_v51 = vmul.f32 0.00390625, %v76_v49  ;;  %v64_v52 = vpop.xlane.xlu0 %63 }
  0x8e   :  { %v80_v54 = vmul.f32 0.00390625, %v64_v52 }
  0x8f   :  { %v114_v56 = vperm.slane %v84_v51, %v105_v47 }
  0x90   :  { %v106_v58 = vperm.slane %v80_v54, %v105_v47 }
  0x91   :  { %v115_v60 = vsel %vm107_vm2, %v114_v56, %v113_v59 }
  0x92   :  { %v119_v62 = vmul.f32 %v115_v60, %v85_v57  ;;  %v108_v63 = vsel %vm107_vm2, %v106_v58, %v104_v61 }
  0x93   :  { %v118_v3 = vmul.f32 %v108_v63, %v85_v57 }
  0x94   :  { %v124_v7 = vsel %vm120_vm3, %v119_v62, 0.0 }
  0x95   :  { %125 = vadd.xlane.f32.xlu0 %v124_v7  ;;  %v121_v8 = vsel %vm120_vm3, %v118_v3, 0.0 }
  0x96   :  { %122 = vadd.xlane.f32.xlu2 %v121_v8 }
  0xa4   :  { %v135_v16 = vpop.permute.xlu1 %134 }
 0x108   :  { %v126_v17 = vpop.xlane.xlu0 %125 }
 0x109   :  { %v123_v22 = vpop.xlane.xlu2 %122  ;;  %v138_v23 = vadd.f32 %v135_v16, %v126_v17 }
 0x10a   :  { %v137_v24 = vadd.f32 %v135_v16, %v123_v22 }
 0x10b   :  { %v140_v26 = vmax.f32 %v138_v23, 0.0 }
 0x10c   :  { %v139_v28 = vmax.f32 %v137_v24, 0.0 }
 0x10d   :  { %151 = vperm.xlu0 %505, %v140_v26  }
 0x10e   :  { %148 = vperm.xlu2 %504, %v139_v28  }
 0x115   :  { %507 = vset.pattern.permute.xlu0 %v225_v29 }
 0x116   :  { %506 = vset.pattern.permute.xlu2 %v219_v44 }
 0x168   :  { %v149_v30 = vpop.permute.xlu2 %148 }
 0x169   :  { %v153_v35 = vperm.slane %v149_v30, %v699_v31 }
 0x16b   :  { %v176_v36 = vmul.f32 %v153_v35, %v142_v32  ;;  %v175_v37 = vmul.f32 %v153_v35, %v141_v33  ;;  %v177_v38 = vmul.f32 %v153_v35, %v143_v34  ;;  %v178_v45 = vmul.f32 %v153_v35, %v144_v42 }
 0x16d   :  { %v187_v39 = vsel %vm183_vm4, %v176_v36, 0.0  ;;  %v184_v40 = vsel %vm183_vm4, %v175_v37, 0.0  ;;  %v190_v41 = vsel %vm183_vm4, %v177_v38, 0.0  ;;  %v193_v46 = vsel %vm183_vm4, %v178_v45, 0.0 }
 0x16e   :  { %188 = vadd.xlane.f32.xlu1 %v187_v39  ;;  %185 = vadd.xlane.f32.xlu2 %v184_v40 }
 0x16f   :  { %191 = vadd.xlane.f32.xlu0 %v190_v41 }
 0x176   :  { %194 = vadd.xlane.f32.xlu2 %v193_v46 }
 0x17f   :  { %v152_v47 = vpop.permute.xlu0 %151 }
 0x180   :  { %v154_v48 = vperm.slane %v152_v47, %v699_v31  ;;  %v216_v31 = vpop.permute.xlu1 %215 }
 0x182   :  { %v180_v49 = vmul.f32 %v154_v48, %v142_v32  ;;  %v179_v50 = vmul.f32 %v154_v48, %v141_v33  ;;  %v182_v25 = vmul.f32 %v154_v48, %v144_v42  ;;  %v181_v53 = vmul.f32 %v154_v48, %v143_v34 }
 0x183   :  { %227 = vperm.xlu0 %507, %v696_v27  }
 0x184   :  { %v199_v51 = vsel %vm183_vm4, %v180_v49, 0.0  ;;  %v196_v52 = vsel %vm183_vm4, %v179_v50, 0.0  ;;  %v205_v54 = vsel %vm183_vm4, %v182_v25, 0.0  ;;  %v202_v55 = vsel %vm183_vm4, %v181_v53, 0.0 }
 0x185   :  { %200 = vadd.xlane.f32.xlu2 %v199_v51  ;;  %197 = vadd.xlane.f32.xlu1 %v196_v52 }
 0x18b   :  { %511 = vset.pattern.permute.xlu0 %v601_v15 }
 0x18d   :  { %206 = vadd.xlane.f32.xlu2 %v205_v54  ;;  %203 = vadd.xlane.f32.xlu1 %v202_v55 }
 0x1a5   :  { %221 = vperm.xlu2 %506, %v696_v27  }
 0x1a6   :  { %233 = vperm.xlu1 %508, %v696_v27  }
 0x1ad   :  { %509 = vset.pattern.permute.xlu2 %v601_v15 }
 0x1ae   :  { %510 = vset.pattern.permute.xlu1 %v601_v15 }
 0x1e1   :  { %v186_v56 = vpop.xlane.xlu2 %185  ;;  %v189_v62 = vpop.xlane.xlu1 %188 }
 0x1e2   :  { %v239_v57 = vadd.f32 %v216_v31, %v186_v56  ;;  %v192_v61 = vpop.xlane.xlu0 %191 }
 0x1e4   :  { %v490_v58 = vmul.f32 -1.442695, %v239_v57 }
 0x1e6   :  { %514 = vpow2.f32 %v490_v58 }
 0x1e9   :  { %v737_v63 = vpop.xlane.xlu2 %194 }
 0x1ec   :  { %v515_v59 = vpop.eup %514 }
 0x1ed   :  { %v271_v60 = vadd.f32 1.0, %v515_v59 }
 0x1ef   :  { %516 = vrcp.f32 %v271_v60  ;;  %v290_v24 = vand.u32 2147483648, %v271_v60  ;;  %v288_v28 = vand.u32 2147483647, %v271_v60  ;;  %vm284_vm6 = vweird.f32 %v271_v60 }
 0x1f1   :  { %v291_v32 = vor.u32 1.1754944e-38, %v290_v24  ;;  %vm289_vm8 = vcmp.eq.f32.partialorder %v288_v28, 8.507059e+37 }
 0x1f5   :  { %v517_v3 = vpop.eup %516  ;;  %v228_v7 = vpop.permute.xlu0 %227 }
 0x1f6   :  { %v241_v8 = vadd.f32 %v228_v7, %v192_v61  ;;  %v280_v16 = vmul.f32 %v517_v3, %v271_v60  ;;  %vm285_vm5 = vweird.f32 %v517_v3 }
 0x1f7   :  { %vm286_vm7 = vmor %vm284_vm6, %vm285_vm5 }
 0x1f8   :  { %v492_v17 = vmul.f32 -1.442695, %v241_v8  ;;  %v201_v27 = vpop.xlane.xlu2 %200  ;;  %v198_v22 = vpop.xlane.xlu1 %197  ;;  %v281_v15 = vsub.f32 1.0, %v280_v16 }
 0x1f9   :  { %v243_v23 = vadd.f32 %v216_v31, %v198_v22 }
 0x1fa   :  { %518 = vpow2.f32 %v492_v17  ;;  %v282_v26 = vmul.f32 %v517_v3, %v281_v15 }
 0x1fb   :  { %v494_v29 = vmul.f32 -1.442695, %v243_v23 }
 0x1fc   :  { %v283_v30 = vadd.f32 %v517_v3, %v282_v26 }
 0x1fd   :  { %520 = vpow2.f32 %v494_v29 }
 0x1fe   :  { %v287_v33 = vsel %vm286_vm7, %v517_v3, %v283_v30 }
 0x1ff   :  { %v292_v34 = vsel %vm289_vm8, %v291_v32, %v287_v33 }
 0x200   :  { %v519_v35 = vpop.eup %518  ;;  %401 = vperm.xlu2 %509, %v292_v34   ;;  %v207_v36 = vpop.xlane.xlu2 %206 }
 0x201   :  { %v273_v37 = vadd.f32 1.0, %v519_v35  ;;  %v204_v44 = vpop.xlane.xlu1 %203 }
 0x202   :  { %v245_v50 = vadd.f32 %v228_v7, %v204_v44 }
 0x203   :  { %v521_v38 = vpop.eup %520  ;;  %522 = vrcp.f32 %v273_v37  ;;  %v320_v51 = vand.u32 2147483648, %v273_v37  ;;  %v318_v53 = vand.u32 2147483647, %v273_v37  ;;  %vm314_vm10 = vweird.f32 %v273_v37 }
 0x204   :  { %v275_v39 = vadd.f32 1.0, %v521_v38  ;;  %v496_v31 = vmul.f32 -1.442695, %v245_v50 }
 0x205   :  { %v321_v56 = vor.u32 1.1754944e-38, %v320_v51  ;;  %vm319_vm12 = vcmp.eq.f32.partialorder %v318_v53, 8.507059e+37 }
 0x206   :  { %524 = vrcp.f32 %v275_v39  ;;  %v350_v7 = vand.u32 2147483648, %v275_v39  ;;  %vm344_vm14 = vweird.f32 %v275_v39  ;;  %v348_v16 = vand.u32 2147483647, %v275_v39 }
 0x208   :  { %v222_v40 = vpop.permute.xlu2 %221  ;;  %v351_v23 = vor.u32 1.1754944e-38, %v350_v7  ;;  %vm349_vm0 = vcmp.eq.f32.partialorder %v348_v16, 8.507059e+37 }
 0x209   :  { %v523_v41 = vpop.eup %522  ;;  %v240_v42 = vadd.f32 %v222_v40, %v189_v62  ;;  %v244_v43 = vadd.f32 %v222_v40, %v201_v27 }
 0x20a   :  { %v310_v45 = vmul.f32 %v523_v41, %v273_v37  ;;  %vm315_vm9 = vweird.f32 %v523_v41 }
 0x20b   :  { %v491_v46 = vmul.f32 -1.442695, %v240_v42  ;;  %v495_v47 = vmul.f32 -1.442695, %v244_v43  ;;  %vm316_vm11 = vmor %vm314_vm10, %vm315_vm9 }
 0x20c   :  { %v525_v48 = vpop.eup %524  ;;  %v311_v49 = vsub.f32 1.0, %v310_v45 }
 0x20d   :  { %526 = vpow2.f32 %v491_v46  ;;  %v340_v52 = vmul.f32 %v525_v48, %v275_v39  ;;  %vm345_vm13 = vweird.f32 %v525_v48 }
 0x20e   :  { %v312_v25 = vmul.f32 %v523_v41, %v311_v49  ;;  %528 = vpow2.f32 %v495_v47  ;;  %vm346_vm15 = vmor %vm344_vm14, %vm345_vm13 }
 0x20f   :  { %v341_v54 = vsub.f32 1.0, %v340_v52  ;;  %530 = vpow2.f32 %v496_v31 }
 0x210   :  { %v313_v55 = vadd.f32 %v523_v41, %v312_v25 }
 0x211   :  { %v342_v57 = vmul.f32 %v525_v48, %v341_v54 }
 0x212   :  { %v317_v58 = vsel %vm316_vm11, %v523_v41, %v313_v55 }
 0x213   :  { %v527_v59 = vpop.eup %526  ;;  %v322_v60 = vsel %vm319_vm12, %v321_v56, %v317_v58  ;;  %v343_v62 = vadd.f32 %v525_v48, %v342_v57 }
 0x214   :  { %v272_v61 = vadd.f32 1.0, %v527_v59  ;;  %411 = vperm.xlu2 %509, %v322_v60   ;;  %v529_v3 = vpop.eup %528 }
 0x215   :  { %v276_v8 = vadd.f32 1.0, %v529_v3  ;;  %v347_v27 = vsel %vm346_vm15, %v525_v48, %v343_v62  ;;  %v531_v24 = vpop.eup %530 }
 0x216   :  { %532 = vrcp.f32 %v272_v61  ;;  %v352_v29 = vsel %vm349_vm0, %v351_v23, %v347_v27  ;;  %v740_v34 = vadd.f32 1.0, %v531_v24  ;;  %v305_v38 = vand.u32 2147483648, %v272_v61 }
 0x217   :  { %534 = vrcp.f32 %v276_v8  ;;  %v365_v40 = vand.u32 2147483648, %v276_v8  ;;  %vm299_vm2 = vweird.f32 %v272_v61  ;;  %v363_v43 = vand.u32 2147483647, %v276_v8 }
 0x218   :  { %v234_v17 = vpop.permute.xlu1 %233  ;;  %vm359_vm4 = vweird.f32 %v276_v8  ;;  %v306_v47 = vor.u32 1.1754944e-38, %v305_v38 }
 0x219   :  { %v242_v22 = vadd.f32 %v234_v17, %v737_v63  ;;  %v246_v15 = vadd.f32 %v234_v17, %v207_v36  ;;  %v303_v36 = vand.u32 2147483647, %v272_v61  ;;  %v366_v51 = vor.u32 1.1754944e-38, %v365_v40 }
 0x21a   :  { %vm364_vm8 = vcmp.eq.f32.partialorder %v363_v43, 8.507059e+37 }
 0x21b   :  { %v493_v26 = vmul.f32 -1.442695, %v242_v22  ;;  %v497_v28 = vmul.f32 -1.442695, %v246_v15  ;;  %vm304_vm6 = vcmp.eq.f32.partialorder %v303_v36, 8.507059e+37 }
 0x21c   :  { %v533_v30 = vpop.eup %532  ;;  %421 = vperm.xlu2 %509, %v352_v29  }
 0x21d   :  { %536 = vpow2.f32 %v493_v26  ;;  %v295_v32 = vmul.f32 %v533_v30, %v272_v61  ;;  %v535_v33 = vpop.eup %534  ;;  %vm300_vm1 = vweird.f32 %v533_v30 }
 0x21e   :  { %538 = vpow2.f32 %v497_v28  ;;  %v355_v35 = vmul.f32 %v535_v33, %v276_v8  ;;  %vm360_vm3 = vweird.f32 %v535_v33  ;;  %vm301_vm5 = vmor %vm299_vm2, %vm300_vm1  ;;  %vm374_vm2 = vweird.f32 %v740_v34 }
 0x21f   :  { %v296_v37 = vsub.f32 1.0, %v295_v32  ;;  %540 = vrcp.f32 %v740_v34  ;;  %vm361_vm7 = vmor %vm359_vm4, %vm360_vm3 }
 0x220   :  { %v356_v39 = vsub.f32 1.0, %v355_v35  ;;  %v378_v35 = vand.u32 2147483647, %v740_v34 }
 0x221   :  { %v297_v63 = vmul.f32 %v533_v30, %v296_v37 }
 0x222   :  { %v357_v42 = vmul.f32 %v535_v33, %v356_v39  ;;  %vm379_vm4 = vcmp.eq.f32.partialorder %v378_v35, 8.507059e+37 }
 0x223   :  { %v537_v41 = vpop.eup %536  ;;  %v298_v44 = vadd.f32 %v533_v30, %v297_v63 }
 0x224   :  { %v539_v45 = vpop.eup %538  ;;  %v274_v46 = vadd.f32 1.0, %v537_v41  ;;  %v358_v49 = vadd.f32 %v535_v33, %v357_v42 }
 0x225   :  { %v278_v48 = vadd.f32 1.0, %v539_v45  ;;  %v302_v50 = vsel %vm301_vm5, %v533_v30, %v298_v44  ;;  %v541_v53 = vpop.eup %540 }
 0x226   :  { %542 = vrcp.f32 %v274_v46  ;;  %v307_v52 = vsel %vm304_vm6, %v306_v47, %v302_v50  ;;  %v362_v25 = vsel %vm361_vm7, %v535_v33, %v358_v49  ;;  %v370_v55 = vmul.f32 %v541_v53, %v740_v34 }
 0x227   :  { %544 = vrcp.f32 %v278_v48  ;;  %406 = vperm.xlu1 %510, %v307_v52   ;;  %v367_v54 = vsel %vm364_vm8, %v366_v51, %v362_v25  ;;  %v335_v61 = vand.u32 2147483648, %v274_v46  ;;  %v333_v7 = vand.u32 2147483647, %v274_v46 }
 0x228   :  { %426 = vperm.xlu0 %511, %v367_v54   ;;  %v371_v60 = vsub.f32 1.0, %v370_v55  ;;  %v395_v8 = vand.u32 2147483648, %v278_v48  ;;  %v393_v17 = vand.u32 2147483647, %v278_v48  ;;  %vm329_vm11 = vweird.f32 %v274_v46 }
 0x229   :  { %v336_v15 = vor.u32 1.1754944e-38, %v335_v61  ;;  %vm389_vm13 = vweird.f32 %v278_v48  ;;  %vm334_vm14 = vcmp.eq.f32.partialorder %v333_v7, 8.507059e+37  ;;  %vm375_vm1 = vweird.f32 %v541_v53 }
 0x22a   :  { %v372_v22 = vmul.f32 %v541_v53, %v371_v60  ;;  %v396_v26 = vor.u32 1.1754944e-38, %v395_v8  ;;  %vm394_vm0 = vcmp.eq.f32.partialorder %v393_v17, 8.507059e+37  ;;  %v380_v33 = vand.u32 2147483648, %v740_v34  ;;  %vm376_vm3 = vmor %vm374_vm2, %vm375_vm1 }
 0x22c   :  { %v543_v31 = vpop.eup %542  ;;  %v373_v32 = vadd.f32 %v541_v53, %v372_v22  ;;  %v381_v38 = vor.u32 1.1754944e-38, %v380_v33 }
 0x22d   :  { %v545_v56 = vpop.eup %544  ;;  %v325_v57 = vmul.f32 %v543_v31, %v274_v46  ;;  %vm330_vm9 = vweird.f32 %v543_v31 }
 0x22e   :  { %v385_v58 = vmul.f32 %v545_v56, %v278_v48  ;;  %vm390_vm10 = vweird.f32 %v545_v56  ;;  %vm331_vm12 = vmor %vm329_vm11, %vm330_vm9  ;;  %v377_v37 = vsel %vm376_vm3, %v541_v53, %v373_v32 }
 0x22f   :  { %v326_v59 = vsub.f32 1.0, %v325_v57  ;;  %vm391_vm15 = vmor %vm389_vm13, %vm390_vm10  ;;  %v382_v39 = vsel %vm379_vm4, %v381_v38, %v377_v37 }
 0x230   :  { %v386_v62 = vsub.f32 1.0, %v385_v58 }
 0x231   :  { %v327_v3 = vmul.f32 %v543_v31, %v326_v59 }
 0x232   :  { %v387_v16 = vmul.f32 %v545_v56, %v386_v62 }
 0x233   :  { %v328_v27 = vadd.f32 %v543_v31, %v327_v3 }
 0x234   :  { %v388_v23 = vadd.f32 %v545_v56, %v387_v16 }
 0x235   :  { %v332_v24 = vsel %vm331_vm12, %v543_v31, %v328_v27 }
 0x236   :  { %v337_v28 = vsel %vm334_vm14, %v336_v15, %v332_v24  ;;  %v392_v29 = vsel %vm391_vm15, %v545_v56, %v388_v23 }
 0x237   :  { %416 = vperm.xlu1 %510, %v337_v28   ;;  %v397_v30 = vsel %vm394_vm0, %v396_v26, %v392_v29 }
 0x238   :  { %436 = vperm.xlu2 %509, %v397_v30  }
 0x23f   :  { %431 = vperm.xlu1 %510, %v382_v39  }
 0x25a   :  { %v402_v63 = vpop.permute.xlu2 %401 }
 0x25b   :  { %v439_v36 = vmul.f32 %v402_v63, %v643_v2  ;;  %v440_v40 = vmul.f32 %v402_v63, %v647_v4 }
 0x25d   :  { %455 = vst [vmem:[#allocation5] sm:$0xff] %v439_v36 }
 0x25e   :  { %456 = vst [vmem:[#allocation5 + $0x8] sm:$0xff] %v440_v40 }
 0x26e   :  { %v412_v41 = vpop.permute.xlu2 %411 }
 0x26f   :  { %v443_v42 = vmul.f32 %v412_v41, %v649_v5  ;;  %v444_v43 = vmul.f32 %v412_v41, %v651_v6 }
 0x271   :  { %459 = vst [vmem:[#allocation5 + $0x20] sm:$0xff] %v443_v42 }
 0x272   :  { %460 = vst [vmem:[#allocation5 + $0x28] sm:$0xff] %v444_v43 }
 0x276   :  { %v422_v34 = vpop.permute.xlu2 %421 }
 0x277   :  { %v447_v44 = vmul.f32 %v422_v34, %v639_v0  ;;  %v448_v45 = vmul.f32 %v422_v34, %v641_v1 }
 0x279   :  { %463 = vst [vmem:[#allocation5 + $0x40] sm:$0xff] %v447_v44 }
 0x27a   :  { %464 = vst [vmem:[#allocation5 + $0x48] sm:$0xff] %v448_v45 }
 0x292   :  { %v437_v46 = vpop.permute.xlu2 %436 }
 0x293   :  { %v453_v2 = vmul.f32 %v437_v46, %v675_v18  ;;  %v454_v4 = vmul.f32 %v437_v46, %v677_v19 }
 0x295   :  { %469 = vst [vmem:[#allocation5 + $0x70] sm:$0xff] %v453_v2 }
 0x296   :  { %470 = vst [vmem:[#allocation5 + $0x78] sm:$0xff] %v454_v4 }
 0x299   :  { %v407_v47 = vpop.permute.xlu1 %406 }
 0x29a   :  { %v441_v5 = vmul.f32 %v407_v47, %v661_v11  ;;  %v442_v6 = vmul.f32 %v407_v47, %v663_v12  ;;  %v427_v48 = vpop.permute.xlu0 %426 }
 0x29b   :  { %v449_v0 = vmul.f32 %v427_v48, %v657_v9  ;;  %v450_v1 = vmul.f32 %v427_v48, %v659_v10 }
 0x29c   :  { %457 = vst [vmem:[#allocation5 + $0x10] sm:$0xff] %v441_v5 }
 0x29d   :  { %458 = vst [vmem:[#allocation5 + $0x18] sm:$0xff] %v442_v6 }
 0x29e   :  { %465 = vst [vmem:[#allocation5 + $0x50] sm:$0xff] %v449_v0 }
 0x29f   :  { %466 = vst [vmem:[#allocation5 + $0x58] sm:$0xff] %v450_v1 }
 0x2a9   :  { %v417_v49 = vpop.permute.xlu1 %416 }
 0x2aa   :  { %v445_v18 = vmul.f32 %v417_v49, %v679_v20  ;;  %v446_v19 = vmul.f32 %v417_v49, %v681_v21 }
 0x2ac   :  { %461 = vst [vmem:[#allocation5 + $0x30] sm:$0xff] %v445_v18 }
 0x2ad   :  { %462 = vst [vmem:[#allocation5 + $0x38] sm:$0xff] %v446_v19 }
 0x2b1   :  { %v432_v11 = vpop.permute.xlu1 %431 }
 0x2b2   :  { %v451_v9 = vmul.f32 %v432_v11, %v665_v13  ;;  %v452_v10 = vmul.f32 %v432_v11, %v667_v14 }
 0x2b4   :  { %467 = vst [vmem:[#allocation5 + $0x60] sm:$0xff] %v451_v9 }
 0x2b5   :  { %468 = vst [vmem:[#allocation5 + $0x68] sm:$0xff] %v452_v10 }
 0x2b6   :  { %483 = dma.vmem_to_hbm [thread:$0]  %s476_s10, 2048, %s478_s13, [#allocation4], %s599_s23, %s599_s23, %s600_s24  }
 0x2b7   :  { %596 = dma.done.wait [#allocation4], 2048  }
 0x2b8   :  { %597 = vsyncadd [#allocation4], 4294965248 }
 0x2b9   :  { %488 = vsyncpa [#allocation3], 1 }
 0x2ba   :  { %489 = vsyncpa [#allocation4], 1 }

</bundles_post_ra>
